<compile_context>
chip_gen: v6e
topology: v6e:2x2x1
jax: 0.10.0
libtpu: 0.0.40
codegen_flags: <defaults>
</compile_context>

<pallas_src>
import functools
import math

import jax
import jax.numpy as jnp
from jax.experimental import pallas as pl
from jax.experimental.pallas import tpu as pltpu


def _round_up(x, m):
    return ((x + m - 1) // m) * m


def _cdiv(a, b):
    return -(-a // b)


def _nbytes(shape, dtype):
    return math.prod(shape) * jnp.dtype(dtype).itemsize


def _device_defaults():
    """(block_tokens, block_ff, vmem_cap_bytes) tuned per TPU generation."""
    try:
        kind = jax.devices()[0].device_kind.lower()
    except Exception:
        kind = ""
    if "v6" in kind:
        # 128 MiB physical VMEM, ~650 flops/byte roofline knee -> big token tile.
        return 1024, 2048, 100 << 20
    if "v5" in kind:
        return 512, 2048, 100 << 20
    if "v7" in kind:
        # Only 64 MiB per TensorCore -> leave headroom for internal scratch.
        return 512, 1024, 48 << 20
    return 512, 1024, 48 << 20  # conservative default


# ------------------------------ kernels -------------------------------------


def _ffn_resident_kernel(x_ref, w1_ref, b1_ref, w2_ref, b2_ref, o_ref):
    # Full bf16 W1/W2 are VMEM-resident (constant index_map): DMA'd once and
    # reused for every token tile.  Single fused pass per token tile.
    h = jnp.dot(x_ref[...], w1_ref[...], preferred_element_type=jnp.float32)
    h = jnp.maximum(h + b1_ref[...], 0.0)
    y = jnp.dot(h.astype(w2_ref.dtype), w2_ref[...],
                preferred_element_type=jnp.float32)
    # TODO(synk): train-mode dropout (pltpu.prng_seed + stateful_bernoulli) if
    # needed; eval-mode nn.Dropout is identity, reproduced here.
    o_ref[...] = (y + b2_ref[...]).astype(o_ref.dtype)


def _ffn_streamed_kernel(x_ref, w1_ref, b1_ref, w2_ref, b2_ref, o_ref, acc_ref):
    # d_ff streamed over trailing "arbitrary" axis; f32 accumulator in VMEM.
    k = pl.program_id(1)

    @pl.when(k == 0)
    def _():
        # Fold b2 into the accumulator init: epilogue becomes pure cast+store.
        acc_ref[...] = jnp.broadcast_to(b2_ref[...], acc_ref.shape)

    h = jnp.dot(x_ref[...], w1_ref[...], preferred_element_type=jnp.float32)
    h = jnp.maximum(h + b1_ref[...], 0.0)
    acc_ref[...] += jnp.dot(h.astype(w2_ref.dtype), w2_ref[...],
                            preferred_element_type=jnp.float32)

    @pl.when(k == pl.num_programs(1) - 1)
    def _():
        # TODO(synk): train-mode dropout if needed; eval-mode is identity.
        o_ref[...] = acc_ref[...].astype(o_ref.dtype)


# ------------------------------ wrapper --------------------------------------


def prepare_ffn_params(w1, b1, w2, b2):
    """Pad weights to lane-dense multiples of 128 and cast to bf16 ONCE.

    Run this outside the per-step forward so W1/W2 are not re-read / re-written
    in HBM on every call.  Weights are stored [in, out] (pre-transposed vs
    PyTorch nn.Linear).
    """
    d_model, d_ff = w1.shape
    dm_p = _round_up(d_model, 128)
    dff_p = _round_up(d_ff, 128)
    w1p = jnp.pad(jnp.asarray(w1),
                  ((0, dm_p - d_model), (0, dff_p - d_ff))).astype(jnp.bfloat16)
    w2p = jnp.pad(jnp.asarray(w2),
                  ((0, dff_p - d_ff), (0, dm_p - d_model))).astype(jnp.bfloat16)
    b1p = jnp.pad(jnp.asarray(b1).reshape(1, d_ff),
                  ((0, 0), (0, dff_p - d_ff))).astype(jnp.float32)
    b2p = jnp.pad(jnp.asarray(b2).reshape(1, d_model),
                  ((0, 0), (0, dm_p - d_model))).astype(jnp.float32)
    return w1p, b1p, w2p, b2p


@functools.partial(jax.jit, static_argnames=("block_tokens", "block_ff"))
def position_wise_network(x, w1p, b1p, w2p, b2p, *,
                          block_tokens=None, block_ff=None):
    """x: [batch, seq, d_model] float32.  w1p/b1p/w2p/b2p from prepare_ffn_params.

    Returns [batch, seq, d_model] with x.dtype.
    """
    batch, seq, d_model = x.shape
    dm_p, dff_p = w1p.shape
    n_tok = batch * seq
    cdt = jnp.bfloat16

    def_bt, def_bff, vmem_cap = _device_defaults()
    if block_tokens is None:
        block_tokens = def_bt
    if block_ff is None:
        block_ff = def_bff

    # ---- balanced token tiling (avoid a mostly-zero last tile) --------------
    n_tiles = max(1, _cdiv(n_tok, block_tokens))
    tm = _round_up(_cdiv(n_tok, n_tiles), 16)          # bf16 sublane packing
    n_tok_p = _round_up(n_tok, tm)

    # ---- VMEM footprint models (incl. compiler-managed h intermediates) -----
    def resident_vmem(tm_):
        return (2 * _nbytes((tm_, dm_p), cdt)            # x tiles (dbl-buffered)
                + 2 * _nbytes((tm_, dm_p), x.dtype)      # out tiles
                + 2 * _nbytes((dm_p, dff_p), cdt)        # W1 (count 2x, safe)
                + 2 * _nbytes((dff_p, dm_p), cdt)        # W2
                + 2 * _nbytes((1, dff_p), jnp.float32)   # b1
                + 2 * _nbytes((1, dm_p), jnp.float32)    # b2
                + _nbytes((tm_, dff_p), jnp.float32)     # h (f32 intermediate)
                + _nbytes((tm_, dff_p), cdt))            # h bf16 cast copy

    def streamed_vmem(tm_, tff_):
        return (2 * _nbytes((tm_, dm_p), cdt)
                + 2 * _nbytes((tm_, dm_p), x.dtype)
                + 2 * _nbytes((dm_p, tff_), cdt)
                + 2 * _nbytes((tff_, dm_p), cdt)
                + 2 * _nbytes((1, tff_), jnp.float32)
                + 2 * _nbytes((1, dm_p), jnp.float32)
                + _nbytes((tm_, dm_p), jnp.float32)      # accumulator scratch
                + _nbytes((tm_, tff_), jnp.float32)      # h intermediate
                + _nbytes((tm_, tff_), cdt))             # h bf16 cast copy

    headroom = 4 << 20
    use_resident = resident_vmem(tm) + headroom <= vmem_cap

    if not use_resident:
        # Pick a d_ff slab that divides the padded d_ff and fits the budget.
        tff = min(block_ff, dff_p)
        while dff_p % tff:
            tff -= 128
        while streamed_vmem(tm, tff) + headroom > vmem_cap and tff > 128:
            tff = max(128, tff // 2)
            while dff_p % tff:
                tff -= 128
        while streamed_vmem(tm, tff) + headroom > vmem_cap and tm > 128:
            tm = max(128, _round_up(tm // 2, 16))
        n_tok_p = _round_up(n_tok, tm)

    # ---- pad + cast activations (weights already padded/cast) ---------------
    x2d = x.reshape(n_tok, d_model)
    x2d = jnp.pad(x2d, ((0, n_tok_p - n_tok), (0, dm_p - d_model))).astype(cdt)

    out_itemsize = jnp.dtype(x.dtype).itemsize
    flops = 4 * n_tok_p * dm_p * dff_p  # two matmuls, 2 flops/MAC

    if use_resident:
        grid = (n_tok_p // tm,)
        vmem_limit = min(int(resident_vmem(tm) * 1.25) + headroom, vmem_cap)
        cost = pl.CostEstimate(
            flops=flops, transcendentals=0,
            bytes_accessed=(x2d.size * 2 + w1p.size * 2 + w2p.size * 2
                            + b1p.size * 4 + b2p.size * 4
                            + n_tok_p * dm_p * out_itemsize))
        out2d = pl.pallas_call(
            _ffn_resident_kernel,
            out_shape=jax.ShapeDtypeStruct((n_tok_p, dm_p), x.dtype),
            grid_spec=pltpu.PrefetchScalarGridSpec(
                num_scalar_prefetch=0,
                grid=grid,
                in_specs=[
                    pl.BlockSpec((tm, dm_p), lambda i: (i, 0)),      # x tile
                    pl.BlockSpec((dm_p, dff_p), lambda i: (0, 0)),   # W1 resident
                    pl.BlockSpec((1, dff_p), lambda i: (0, 0)),      # b1
                    pl.BlockSpec((dff_p, dm_p), lambda i: (0, 0)),   # W2 resident
                    pl.BlockSpec((1, dm_p), lambda i: (0, 0)),       # b2
                ],
                out_specs=pl.BlockSpec((tm, dm_p), lambda i: (i, 0)),
            ),
            compiler_params=pltpu.CompilerParams(
                dimension_semantics=("parallel",),
                vmem_limit_bytes=vmem_limit,
            ),
            cost_estimate=cost,
        )(x2d, w1p, b1p, w2p, b2p)
    else:
        grid = (n_tok_p // tm, dff_p // tff)
        vmem_limit = min(int(streamed_vmem(tm, tff) * 1.25) + headroom, vmem_cap)
        n_tok_tiles = grid[0]
        cost = pl.CostEstimate(
            flops=flops, transcendentals=0,
            bytes_accessed=(x2d.size * 2
                            + (w1p.size * 2 + w2p.size * 2 + b1p.size * 4)
                            * n_tok_tiles
                            + b2p.size * 4
                            + n_tok_p * dm_p * out_itemsize))
        out2d = pl.pallas_call(
            _ffn_streamed_kernel,
            out_shape=jax.ShapeDtypeStruct((n_tok_p, dm_p), x.dtype),
            grid_spec=pltpu.PrefetchScalarGridSpec(
                num_scalar_prefetch=0,
                grid=grid,                                            # (tokens, d_ff)
                in_specs=[
                    pl.BlockSpec((tm, dm_p), lambda i, k: (i, 0)),    # x tile
                    pl.BlockSpec((dm_p, tff), lambda i, k: (0, k)),   # W1 col slab
                    pl.BlockSpec((1, tff), lambda i, k: (0, k)),      # b1 slab
                    pl.BlockSpec((tff, dm_p), lambda i, k: (k, 0)),   # W2 row slab
                    pl.BlockSpec((1, dm_p), lambda i, k: (0, 0)),     # b2
                ],
                out_specs=pl.BlockSpec((tm, dm_p), lambda i, k: (i, 0)),
                scratch_shapes=[pltpu.VMEM((tm, dm_p), jnp.float32)],
            ),
            compiler_params=pltpu.CompilerParams(
                dimension_semantics=("parallel", "arbitrary"),
                vmem_limit_bytes=vmem_limit,
            ),
            cost_estimate=cost,
        )(x2d, w1p, b1p, w2p, b2p)

    return out2d[:n_tok, :d_model].reshape(batch, seq, d_model)


# ------------------------------ test harness ---------------------------------


def _init_params(key, d_model, d_ff, dtype=jnp.float32):
    """Deterministic init mimicking nn.Linear's uniform(-1/sqrt(fan_in), +...)."""
    k1, k2, k3, k4 = jax.random.split(key, 4)
    lim1 = 1.0 / (d_model ** 0.5)
    lim2 = 1.0 / (d_ff ** 0.5)
    # Stored pre-transposed vs PyTorch: [in, out]
    w1 = jax.random.uniform(k1, (d_model, d_ff), dtype, -lim1, lim1)
    b1 = jax.random.uniform(k2, (1, d_ff), dtype, -lim1, lim1)
    w2 = jax.random.uniform(k3, (d_ff, d_model), dtype, -lim2, lim2)
    b2 = jax.random.uniform(k4, (1, d_model), dtype, -lim2, lim2)
    return w1, b1, w2, b2


if __name__ == "__main__":
    # Small config consistent with the module: d_model=32, d_ff=64, eval dropout.
    batch, seq, d_model, d_ff = 2, 8, 32, 64

    key = jax.random.PRNGKey(0)
    kx, kp = jax.random.split(key)
    x = jax.random.normal(kx, (batch, seq, d_model), jnp.float32)
    w1, b1, w2, b2 = _init_params(kp, d_model, d_ff)

    # Pad/cast weights ONCE (not per forward call).
    w1p, b1p, w2p, b2p = prepare_ffn_params(w1, b1, w2, b2)
    w1p, b1p, w2p, b2p = jax.block_until_ready((w1p, b1p, w2p, b2p))

    out = position_wise_network(x, w1p, b1p, w2p, b2p)
    out = jax.block_until_ready(out)

    # Reference in plain f32 JAX. Kernel matmuls run in bf16 (f32 accumulation),
    # so tolerance is widened accordingly.
    ref = jnp.maximum(x.reshape(-1, d_model) @ w1 + b1, 0.0) @ w2 + b2
    ref = ref.reshape(batch, seq, d_model)
    assert out.shape == (batch, seq, d_model)
    assert jnp.allclose(out, ref, atol=5e-2, rtol=5e-2), float(
        jnp.max(jnp.abs(out - ref)))

    print("KERNEL_OK")
</pallas_src>

<mosaic_0001>
module attributes {stable_mosaic.version = 11 : i64} {
  func.func @_ffn_resident_kernel(%arg0: i32, %arg1: memref<16x128xbf16, #tpu.memory_space<vmem>>, %arg2: memref<128x128xbf16, #tpu.memory_space<vmem>>, %arg3: memref<1x128xf32, #tpu.memory_space<vmem>>, %arg4: memref<128x128xbf16, #tpu.memory_space<vmem>>, %arg5: memref<1x128xf32, #tpu.memory_space<vmem>>, %arg6: memref<16x128xf32, #tpu.memory_space<vmem>>) attributes {dimension_semantics = [#tpu.dimension_semantics<parallel>], iteration_bounds = array<i64: 1>, scalar_prefetch = 0 : i64, scratch_operands = 0 : i64, tpu.core_type = #tpu.core_type<tc>, window_params = [{transform_indices = @transform_0, window_bounds = array<i64: 16, 128>}, {pipeline_mode = #tpu.pipeline_mode<synchronous>, transform_indices = @transform_1, window_bounds = array<i64: 128, 128>}, {pipeline_mode = #tpu.pipeline_mode<synchronous>, transform_indices = @transform_2, window_bounds = array<i64: 1, 128>}, {pipeline_mode = #tpu.pipeline_mode<synchronous>, transform_indices = @transform_3, window_bounds = array<i64: 128, 128>}, {pipeline_mode = #tpu.pipeline_mode<synchronous>, transform_indices = @transform_4, window_bounds = array<i64: 1, 128>}, {transform_indices = @transform_5, window_bounds = array<i64: 16, 128>}]} {
    %c0 = arith.constant 0 : index
    %c0_0 = arith.constant 0 : index
    %0 = vector.load %arg1[%c0, %c0_0] : memref<16x128xbf16, #tpu.memory_space<vmem>>, vector<16x128xbf16>
    %c0_1 = arith.constant 0 : index
    %c0_2 = arith.constant 0 : index
    %1 = vector.load %arg2[%c0_1, %c0_2] : memref<128x128xbf16, #tpu.memory_space<vmem>>, vector<128x128xbf16>
    %cst = arith.constant dense<0.000000e+00> : vector<16x128xf32>
    %2 = tpu.matmul %0, %1, %cst {dimension_numbers = #tpu.dot_dimension_numbers<[1], [0], [0], [1], [0, 0, 1, 1], [], []>} : vector<16x128xbf16>, vector<128x128xbf16>, vector<16x128xf32> -> vector<16x128xf32>
    %c0_3 = arith.constant 0 : index
    %c0_4 = arith.constant 0 : index
    %3 = vector.load %arg3[%c0_3, %c0_4] : memref<1x128xf32, #tpu.memory_space<vmem>>, vector<1x128xf32>
    %4 = vector.broadcast %3 : vector<1x128xf32> to vector<16x128xf32>
    %5 = arith.addf %2, %4 : vector<16x128xf32>
    %cst_5 = arith.constant 0.000000e+00 : f32
    %6 = vector.broadcast %cst_5 : f32 to vector<16x128xf32>
    %7 = arith.maximumf %5, %6 : vector<16x128xf32>
    %8 = arith.truncf %7 : vector<16x128xf32> to vector<16x128xbf16>
    %c0_6 = arith.constant 0 : index
    %c0_7 = arith.constant 0 : index
    %9 = vector.load %arg4[%c0_6, %c0_7] : memref<128x128xbf16, #tpu.memory_space<vmem>>, vector<128x128xbf16>
    %cst_8 = arith.constant dense<0.000000e+00> : vector<16x128xf32>
    %10 = tpu.matmul %8, %9, %cst_8 {dimension_numbers = #tpu.dot_dimension_numbers<[1], [0], [0], [1], [0, 0, 1, 1], [], []>} : vector<16x128xbf16>, vector<128x128xbf16>, vector<16x128xf32> -> vector<16x128xf32>
    %c0_9 = arith.constant 0 : index
    %c0_10 = arith.constant 0 : index
    %11 = vector.load %arg5[%c0_9, %c0_10] : memref<1x128xf32, #tpu.memory_space<vmem>>, vector<1x128xf32>
    %12 = vector.broadcast %11 : vector<1x128xf32> to vector<16x128xf32>
    %13 = arith.addf %10, %12 : vector<16x128xf32>
    %c0_11 = arith.constant 0 : index
    %c0_12 = arith.constant 0 : index
    %14 = vector.load %arg6[%c0_11, %c0_12] : memref<16x128xf32, #tpu.memory_space<vmem>>, vector<16x128xf32>
    tpu.vector_store %arg6[%c0_11, %c0_12], %13 {strides = array<i32>} : memref<16x128xf32, #tpu.memory_space<vmem>>, vector<16x128xf32>,
    return
  }
  func.func @transform_0(%arg0: i32) -> (i32, i32) {
    %c0_i32 = arith.constant 0 : i32
    %c0_i32_0 = arith.constant 0 : i32
    return %arg0, %c0_i32 : i32, i32
  }
  func.func @transform_1(%arg0: i32) -> (i32, i32) {
    %c0_i32 = arith.constant 0 : i32
    %c0_i32_0 = arith.constant 0 : i32
    %c0_i32_1 = arith.constant 0 : i32
    return %c0_i32, %c0_i32_0 : i32, i32
  }
  func.func @transform_2(%arg0: i32) -> (i32, i32) {
    %c0_i32 = arith.constant 0 : i32
    %c0_i32_0 = arith.constant 0 : i32
    %c0_i32_1 = arith.constant 0 : i32
    return %c0_i32, %c0_i32_0 : i32, i32
  }
  func.func @transform_3(%arg0: i32) -> (i32, i32) {
    %c0_i32 = arith.constant 0 : i32
    %c0_i32_0 = arith.constant 0 : i32
    %c0_i32_1 = arith.constant 0 : i32
    return %c0_i32, %c0_i32_0 : i32, i32
  }
  func.func @transform_4(%arg0: i32) -> (i32, i32) {
    %c0_i32 = arith.constant 0 : i32
    %c0_i32_0 = arith.constant 0 : i32
    %c0_i32_1 = arith.constant 0 : i32
    return %c0_i32, %c0_i32_0 : i32, i32
  }
  func.func @transform_5(%arg0: i32) -> (i32, i32) {
    %c0_i32 = arith.constant 0 : i32
    %c0_i32_0 = arith.constant 0 : i32
    return %arg0, %c0_i32 : i32, i32
  }
}

</mosaic_0001>

<bundles_post_ra>
// kernel: position_wise_network.1
= control target key start
LH: loop header
LB: loop body
LE: loop exit
PB: predicated region body
PF: predicated region fallthrough
CT: control target
= control target key end

     0   :  { %10 = vsyncpa [#allocation3], 0  ;;  %s493_s0 = inlined_call_operand.vmem [shape: bf16[16,128], index: 0, kind: input, shape index: {}]   ;;  %s494_s1 = inlined_call_operand.hbm [shape: bf16[128,128], index: 1, kind: input, shape index: {}]   ;;  %s495_s2 = inlined_call_operand.vmem [shape: f32[1,128], index: 2, kind: input, shape index: {}]   ;;  %s496_s3 = inlined_call_operand.hbm [shape: bf16[128,128], index: 3, kind: input, shape index: {}]   ;;  %s497_s4 = inlined_call_operand.vmem [shape: f32[1,128], index: 4, kind: input, shape index: {}]   ;;  %s498_s5 = inlined_call_operand.vmem [shape: f32[16,128], index: 5, kind: output, shape index: {}]  }
   0x1   :  { %11 = vsyncpa [#allocation5], 0  ;;  %s436_s18 = smov [#allocation2]  }
   0x2   :  { %s19_s19 = sshll.u32 %s436_s18, 4  ;;  %s20_s19 = int_to_ptr.vmem [resolvable:$true] %s19_s19 }
   0x3   :  { %s400_s20 = scalar_lea.vmem %s20_s19, 1024  ;;  %p405_p1 = scmp.lt.s32.totalorder %s20_s19, %s20_s19 }
   0x4   :  { %p401_p0 = scmp.ne.s32.totalorder %s20_s19, %s400_s20  ;;  %p406_p2 = scmp.lt.s32.totalorder %s400_s20, %s400_s20 }
   0x6   :  { %p407_p3 = por %p406_p2, %p405_p1 }
   0x8   :  { %p408_p4 = pnand %p407_p3, %p401_p0 }
   0xa   :  { %411 = shalt.err (!%p408_p4)
}
   0xb   :  { %s437_s21 = smov 64   ;;  %s438_s22 = smov 4  }
   0xc   :  { %25 = dma.hbm_to_vmem [thread:$0]  %s494_s1, 1024, %s20_s19, [#allocation3], %s437_s21, %s437_s21, %s438_s22  }
   0xd   :  { %s439_s25 = smov [#allocation4]  }
   0xe   :  { %s33_s26 = sshll.u32 %s439_s25, 4  ;;  %s34_s26 = int_to_ptr.vmem [resolvable:$true] %s33_s26 }
   0xf   :  { %s420_s27 = scalar_lea.vmem %s34_s26, 1024  ;;  %p425_p6 = scmp.lt.s32.totalorder %s34_s26, %s34_s26 }
  0x10   :  { %p421_p5 = scmp.ne.s32.totalorder %s34_s26, %s420_s27  ;;  %p426_p7 = scmp.lt.s32.totalorder %s420_s27, %s420_s27 }
  0x12   :  { %p427_p8 = por %p426_p7, %p425_p6 }
  0x14   :  { %p428_p9 = pnand %p427_p8, %p421_p5 }
  0x16   :  { %431 = shalt.err (!%p428_p9)
}
  0x17   :  { %39 = dma.hbm_to_vmem [thread:$0]  %s496_s3, 1024, %s34_s26, [#allocation5], %s437_s21, %s437_s21, %s438_s22  }
  0x18   :  { %432 = dma.done.wait [#allocation3], 1024  }
  0x19   :  { %433 = vsyncadd [#allocation3], 4294966272 }
  0x1a   :  { %434 = dma.done.wait [#allocation5], 1024  }
  0x1b   :  { %435 = vsyncadd [#allocation5], 4294966272  ;;  %v440_v0 = vmov 0.0   ;;  %vm441_vm0 = vmmov 0   ;;  %v375_v1 = vld [vmem:[#allocation2 + $0x38] sm:$0xff]   ;;  %v376_v2 = vld [vmem:[#allocation2 + $0x30] sm:$0xff]  }
  0x1c   :  { %329 = vmatprep.subr.bf16.mxu0 %v440_v0  ;;  %345 = vmatprep.mubr.msk.bf16.mxu0 %vm441_vm0, %v440_v0  ;;  %v377_v3 = vld [vmem:[#allocation2 + $0x28] sm:$0xff]   ;;  %v384_v4 = vld [vmem:[#allocation4 + $0x38] sm:$0xff]   ;;  %v378_v5 = vld [vmem:[#allocation2 + $0x20] sm:$0xff]  }
  0x1d   :  { %349 = vmatprep.subr.bf16.mxu1 %v440_v0  ;;  %365 = vmatprep.mubr.msk.bf16.mxu1 %vm441_vm0, %v440_v0  ;;  %v385_v6 = vld [vmem:[#allocation4 + $0x30] sm:$0xff]   ;;  %v379_v7 = vld [vmem:[#allocation2 + $0x18] sm:$0xff]   ;;  %v386_v8 = vld [vmem:[#allocation4 + $0x28] sm:$0xff]  }
  0x1e   :  { %330 = vmatpush3.bf16.msra.mxu0 %v375_v1  ;;  %350 = vmatpush3.bf16.msra.mxu1 %v384_v4  ;;  %v380_v9 = vld [vmem:[#allocation2 + $0x10] sm:$0xff]   ;;  %v387_v10 = vld [vmem:[#allocation4 + $0x20] sm:$0xff]   ;;  %v381_v11 = vld [vmem:[#allocation2 + $0x8] sm:$0xff]  }
  0x1f   :  { %331 = vmatprep.subr.bf16.mxu0 %v440_v0  ;;  %351 = vmatprep.subr.bf16.mxu1 %v440_v0  ;;  %v388_v12 = vld [vmem:[#allocation4 + $0x18] sm:$0xff]   ;;  %v382_v13 = vld [vmem:[#allocation2] sm:$0xff]   ;;  %v389_v15 = vld [vmem:[#allocation4 + $0x10] sm:$0xff]  }
  0x20   :  { %v383_v14 = vld [vmem:[%s493_s0] sm:$0xff]   ;;  %v390_v16 = vld [vmem:[#allocation4 + $0x8] sm:$0xff]  }
  0x21   :  { %v391_v17 = vld [vmem:[#allocation4] sm:$0xff]  }
  0x22   :  { %332 = vmatpush3.bf16.msra.mxu0 %v376_v2  ;;  %352 = vmatpush3.bf16.msra.mxu1 %v385_v6  ;;  %v292_v18 = vld [vmem:[%s495_s2] ss:$0 sm:$0xff] }
  0x23   :  { %333 = vmatprep.subr.bf16.mxu0 %v440_v0  ;;  %353 = vmatprep.subr.bf16.mxu1 %v440_v0  ;;  %v302_v28 = vld [vmem:[%s497_s4] ss:$0 sm:$0xff] }
  0x26   :  { %334 = vmatpush3.bf16.msra.mxu0 %v377_v3  ;;  %354 = vmatpush3.bf16.msra.mxu1 %v386_v8 }
  0x27   :  { %335 = vmatprep.subr.bf16.mxu0 %v440_v0  ;;  %355 = vmatprep.subr.bf16.mxu1 %v440_v0 }
  0x2a   :  { %336 = vmatpush3.bf16.msra.mxu0 %v378_v5  ;;  %356 = vmatpush3.bf16.msra.mxu1 %v387_v10 }
  0x2b   :  { %337 = vmatprep.subr.bf16.mxu0 %v440_v0  ;;  %357 = vmatprep.subr.bf16.mxu1 %v440_v0 }
  0x2e   :  { %338 = vmatpush3.bf16.msra.mxu0 %v379_v7  ;;  %358 = vmatpush3.bf16.msra.mxu1 %v388_v12 }
  0x2f   :  { %339 = vmatprep.subr.bf16.mxu0 %v440_v0  ;;  %359 = vmatprep.subr.bf16.mxu1 %v440_v0 }
  0x32   :  { %340 = vmatpush3.bf16.msra.mxu0 %v380_v9  ;;  %360 = vmatpush3.bf16.msra.mxu1 %v389_v15 }
  0x33   :  { %341 = vmatprep.subr.bf16.mxu0 %v440_v0  ;;  %361 = vmatprep.subr.bf16.mxu1 %v440_v0 }
  0x36   :  { %342 = vmatpush3.bf16.msra.mxu0 %v381_v11  ;;  %362 = vmatpush3.bf16.msra.mxu1 %v390_v16 }
  0x37   :  { %343 = vmatprep.subr.bf16.mxu0 %v440_v0  ;;  %363 = vmatprep.subr.bf16.mxu1 %v440_v0 }
  0x3a   :  { %344 = vmatpush3.bf16.msra.mxu0 %v382_v13  ;;  %364 = vmatpush3.bf16.msra.mxu1 %v391_v17 }
  0x3d   :  { %346 = vmatmul.mubr.bf16.vlgmr.msra.gmra.mxu0 %v383_v14 }
  0xfd   :  { %v162_v19 = vpop.f32.mrf.mxu0 }
  0xfe   :  { %v163_v21 = vadd.f32 %v292_v18, %v162_v19 }
  0xff   :  { %v347_v20 = vpop.f32.mrf.mxu0 }
 0x100   :  { %v169_v25 = vmax.f32 %v163_v21, 0.0 }
 0x101   :  { %v165_v22 = vpop.f32.mrf.mxu0 }
 0x102   :  { %v166_v23 = vadd.f32 %v292_v18, %v165_v22 }
 0x103   :  { %v348_v24 = vpop.f32.mrf.mxu0 }
 0x104   :  { %v170_v26 = vmax.f32 %v166_v23, 0.0 }
 0x106   :  { %v171_v27 = vpack.c.bf16 %v170_v26, %v169_v25 }
 0x108   :  { %366 = vmatmul.mubr.bf16.vlgmr.msra.gmra.mxu1 %v171_v27 }
 0x1c8   :  { %v277_v29 = vpop.f32.mrf.mxu1 }
 0x1c9   :  { %v278_v30 = vadd.f32 %v302_v28, %v277_v29 }
 0x1ca   :  { %v367_v31 = vpop.f32.mrf.mxu1 }
 0x1cb   :  { %284 = vst [vmem:[%s498_s5] sm:$0xff] %v278_v30 }
 0x1cc   :  { %v280_v32 = vpop.f32.mrf.mxu1 }
 0x1cd   :  { %v281_v33 = vadd.f32 %v302_v28, %v280_v32 }
 0x1ce   :  { %v368_v34 = vpop.f32.mrf.mxu1 }
 0x1cf   :  { %285 = vst [vmem:[%s498_s5 + $0x8] sm:$0xff] %v281_v33 }
 0x1d0   :  { %290 = vsyncpa [#allocation3], 1 }
 0x1d1   :  { %291 = vsyncpa [#allocation5], 1 }

</bundles_post_ra>
